<compile_context>
chip_gen: v7x
topology: tpu7x:2x2x1
jax: 0.10.0
libtpu: 0.0.40
codegen_flags: <defaults>
</compile_context>

<pallas_src>
import functools

import jax
import jax.numpy as jnp
from jax.experimental import pallas as pl
from jax.experimental.pallas import tpu as pltpu


def _seq_unfold_kernel(x_ref, o_ref, *, pad: int):
    # x_ref : (BB, Seq, H)      (size-1 channel dim squeezed away by BlockSpec)
    # o_ref : (BB, Seq, F*H)    F = 2*pad + 1
    x = x_ref[...]
    bb, seq, hid = x.shape
    zeros = jnp.zeros((bb, pad, hid), dtype=x.dtype)
    xp = jnp.concatenate([zeros, x, zeros], axis=1)      # (BB, Seq + 2p, H)
    # Frame f at output row i reads input row i + f - pad  ==  xp row i + f.
    chunks = [xp[:, f:f + seq, :] for f in range(2 * pad + 1)]
    # Single lane-dense store of the full (Seq, F*H) output tile.
    o_ref[...] = jnp.concatenate(chunks, axis=-1)


def _pick_batch_block(n, seq, hid, frames, itemsize,
                      budget_bytes=4 * 1024 * 1024):
    """Largest batch block that (a) divides N, (b) keeps the per-step tile
    (input + output) under ~4 MiB, and (c) leaves >= 2 grid steps when N >= 2
    so v7x can shard the parallel grid axis across its two TensorCores."""
    per_batch = seq * hid * itemsize * (1 + frames)
    bb = max(1, min(n, budget_bytes // max(per_batch, 1)))
    if n >= 2:
        bb = max(1, min(bb, n // 2))
    while n % bb:
        bb -= 1
    return bb


def seq_unfold(x: jax.Array, padding=(2, 0)) -> jax.Array:
    """Pallas equivalent of SeqUnfold.forward (F.unfold with kernel=(Seq, 1))."""
    assert x.ndim == 4 and x.shape[1] == 1, x.shape
    pad_h, pad_w = padding
    # TODO(synk): pad_w != 0 would also zero-pad the hidden axis; the module's
    # default (and its docstring) use padding=(p, 0), which is what is built.
    assert pad_w == 0, "only padding=(p, 0) is supported"

    n, _, seq, hid = x.shape
    frames = 2 * pad_h + 1
    bb = _pick_batch_block(n, seq, hid, frames, x.dtype.itemsize)

    kernel = functools.partial(_seq_unfold_kernel, pad=pad_h)
    return pl.pallas_call(
        kernel,
        out_shape=jax.ShapeDtypeStruct((n, seq, frames * hid), x.dtype),
        grid=(n // bb,),
        in_specs=[pl.BlockSpec((bb, pl.Squeezed(), seq, hid),
                               lambda b: (b, 0, 0, 0))],
        out_specs=pl.BlockSpec((bb, seq, frames * hid),
                               lambda b: (b, 0, 0)),
        compiler_params=pltpu.CompilerParams(
            dimension_semantics=("parallel",)),
    )(x)


def _seq_unfold_ref(x, padding=(2, 0)):
    """Pure-jnp reference identical to F.unfold(x, (Seq, 1), padding=(p, 0))."""
    pad_h, _ = padding
    n, _, seq, hid = x.shape
    xp = jnp.pad(x[:, 0], ((0, 0), (pad_h, pad_h), (0, 0)))
    chunks = [xp[:, f:f + seq, :] for f in range(2 * pad_h + 1)]
    return jnp.concatenate(chunks, axis=-1)


if __name__ == "__main__":
    key = jax.random.PRNGKey(0)
    # (N, 1, Seq, hidden) consistent with the module docstring.
    x = jax.random.normal(key, (2, 1, 8, 32), dtype=jnp.float32)

    out = seq_unfold(x, padding=(2, 0))
    out = jax.block_until_ready(out)

    ref = _seq_unfold_ref(x, padding=(2, 0))
    assert out.shape == ref.shape == (2, 8, 5 * 32), out.shape
    assert out.dtype == x.dtype
    assert bool(jnp.array_equal(out, ref)), "mismatch vs reference"

    print("KERNEL_OK")
</pallas_src>

<mosaic_0001>
module attributes {stable_mosaic.version = 11 : i64} {
  func.func @_seq_unfold_kernel(%arg0: i32, %arg1: memref<1x1x8x32xf32, #tpu.memory_space<vmem>>, %arg2: memref<1x8x160xf32, #tpu.memory_space<vmem>>) attributes {dimension_semantics = [#tpu.dimension_semantics<parallel>], iteration_bounds = array<i64: 2>, scalar_prefetch = 0 : i64, scratch_operands = 0 : i64, tpu.core_type = #tpu.core_type<tc>, window_params = [{transform_indices = @transform_0, window_bounds = array<i64: 1, 1, 8, 32>}, {transform_indices = @transform_1, window_bounds = array<i64: 1, 8, 160>}]} {
    %c0 = arith.constant 0 : index
    %c0_0 = arith.constant 0 : index
    %c0_1 = arith.constant 0 : index
    %c0_2 = arith.constant 0 : index
    %0 = vector.load %arg1[%c0, %c0_0, %c0_1, %c0_2] : memref<1x1x8x32xf32, #tpu.memory_space<vmem>>, vector<1x1x8x32xf32>
    %1 = vector.shape_cast %0 : vector<1x1x8x32xf32> to vector<1x8x32xf32>
    %cst = arith.constant 0.000000e+00 : f32
    %2 = vector.broadcast %cst : f32 to vector<1x2x32xf32>
    %3 = tpu.concatenate %2, %1, %2 in 1 : vector<1x2x32xf32>, vector<1x8x32xf32>, vector<1x2x32xf32> -> vector<1x12x32xf32>
    %4 = vector.extract_strided_slice %3 {offsets = [0, 0, 0], sizes = [1, 8, 32], strides = [1, 1, 1]} : vector<1x12x32xf32> to vector<1x8x32xf32>
    %5 = vector.extract_strided_slice %3 {offsets = [0, 1, 0], sizes = [1, 8, 32], strides = [1, 1, 1]} : vector<1x12x32xf32> to vector<1x8x32xf32>
    %6 = vector.extract_strided_slice %3 {offsets = [0, 2, 0], sizes = [1, 8, 32], strides = [1, 1, 1]} : vector<1x12x32xf32> to vector<1x8x32xf32>
    %7 = vector.extract_strided_slice %3 {offsets = [0, 3, 0], sizes = [1, 8, 32], strides = [1, 1, 1]} : vector<1x12x32xf32> to vector<1x8x32xf32>
    %8 = vector.extract_strided_slice %3 {offsets = [0, 4, 0], sizes = [1, 8, 32], strides = [1, 1, 1]} : vector<1x12x32xf32> to vector<1x8x32xf32>
    %9 = tpu.concatenate %4, %5, %6, %7, %8 in 2 : vector<1x8x32xf32>, vector<1x8x32xf32>, vector<1x8x32xf32>, vector<1x8x32xf32>, vector<1x8x32xf32> -> vector<1x8x160xf32>
    %c0_3 = arith.constant 0 : index
    %c0_4 = arith.constant 0 : index
    %c0_5 = arith.constant 0 : index
    %10 = vector.load %arg2[%c0_3, %c0_4, %c0_5] : memref<1x8x160xf32, #tpu.memory_space<vmem>>, vector<1x8x160xf32>
    tpu.vector_store %arg2[%c0_3, %c0_4, %c0_5], %9 {strides = array<i32>} : memref<1x8x160xf32, #tpu.memory_space<vmem>>, vector<1x8x160xf32>,
    return
  }
  func.func @transform_0(%arg0: i32) -> (i32, i32, i32, i32) {
    %c0_i32 = arith.constant 0 : i32
    %c0_i32_0 = arith.constant 0 : i32
    %c0_i32_1 = arith.constant 0 : i32
    %c0_i32_2 = arith.constant 0 : i32
    return %arg0, %c0_i32, %c0_i32_0, %c0_i32_1 : i32, i32, i32, i32
  }
  func.func @transform_1(%arg0: i32) -> (i32, i32, i32) {
    %c0_i32 = arith.constant 0 : i32
    %c0_i32_0 = arith.constant 0 : i32
    %c0_i32_1 = arith.constant 0 : i32
    return %arg0, %c0_i32, %c0_i32_0 : i32, i32, i32
  }
}

</mosaic_0001>

<bundles_post_ra>
// kernel: tpu_custom_call.1
= control target key start
LH: loop header
LB: loop body
LE: loop exit
PB: predicated region body
PF: predicated region fallthrough
CT: control target
= control target key end

     0   :  { %6 = vsyncpa [#allocation3], 0  ;;  %s602_s0 = inlined_call_operand.hbm [shape: f32[2,1,8,32], index: 0, kind: input, shape index: {}]   ;;  %s603_s1 = inlined_call_operand.hbm [shape: f32[2,8,160], index: 1, kind: output, shape index: {}]  }
   0x1   :  { %8 = vsyncpa [#allocation3 + $0x1], 0 }
   0x2   :  { %9 = vsyncpa [#allocation4], 0 }
   0x3   :  { %11 = vsyncpa [#allocation4 + $0x1], 0  ;;  %s436_s6 = smov 0   ;;  %s438_s7 = smov 0  }
   0x4   :  { %s440_s8 = smov 0   ;;  %s442_s9 = smov 0  }
   0x5 LB: > { %s457_s10 = sadd.s32 4294967295, %s419_s9   ;;  %s260_s11 = sadd.s32 4294967294, %s419_s9   ;;  %s419_s9 = sphi %s442_s9, %s618_s9   ;;  %s415_s8 = sphi %s440_s8, %s617_s8   ;;  %s411_s7 = sphi %s438_s7, %s616_s7   ;;  %s407_s6 = sphi %s436_s6, %s615_s6  }
   0x6   : > { %s461_s12 = sadd.s32 1, %s419_s9   ;;  %s24_s13 = sadd.s32 1, %s415_s8 }
   0x7   : > { %s21_s14 = ssub.s32 %s419_s9, %s461_s12  ;;  %p31_p0 = scmp.ne.s32.totalorder %s415_s8, %s411_s7 }
   0x8   : > { %p22_p1 = scmp.eq.s32.totalorder %s21_s14, 0  ;;  %p32_p2 = scmp.eq.s32.totalorder %s419_s9, 0 }
   0x9   : > { %p37_p3 = scmp.ne.s32.totalorder %s411_s7, %s407_s6  ;;  %p38_p4 = scmp.eq.s32.totalorder %s457_s10, 0 }
   0xa   : > { %s473_s15 = scalar_select %p22_p1, %s415_s8, %s24_s13  }
   0xb   : > { %p475_p5 = por %p32_p2, %p31_p0  ;;  %p479_p6 = por %p38_p4, %p37_p3 }
   0xc   : > { %p61_p7 = scmp.eq.s32.totalorder %s457_s10, 1  ;;  %p67_p8 = scmp.eq.s32.totalorder %s260_s11, 1 }
   0xd   : > { %p286_p10 = scmp.lt.s32.totalorder %s419_s9, 2  ;;  %s87_s20 = sand.u32 1, %s415_s8  }
   0xe   : > { %p486_p11 = por %p61_p7, %p31_p0  ;;  %p490_p12 = por %p67_p8, %p37_p3 }
   0xf   : > { %s264_s21 = sshll.u32 %s419_s9, 7  ;;  %s263_s22 = sshll.u32 %s87_s20, 3 }
  0x10   : > { %s607_s18 = scalar_select %p486_p11, 1, 0 }
  0x11   : > { %s608_s19 = scalar_select %p490_p12, 1, 0 }
  0x12   : > { %s499_s25 = scalar_lea.hbm %s602_s0, %s264_s21  ;;  %s91_s26 = scalar_lea.vmem [#allocation2], %s263_s22 }
  0x13   : > { %s98_s27 = sshll.u32 %s91_s26, 4  ;;  %p503_p13 = pnand %p286_p10, %p475_p5  ;;  %s507_s27 = int_to_ptr.vmem [resolvable:$true] %s98_s27 }
  0x14   : > { %s88_s29 = scalar_lea.sflag [#allocation3], %s87_s20  ;;  %s323_s30 = scalar_lea.hbm %s499_s25, 128 }
  0x15   : > { %p324_p2 = scmp.ne.s32.totalorder %s499_s25, %s323_s30  ;;  %p325_p3 = pneg %p503_p13 }
  0x16   : > { %s328_s4 = scalar_lea.hbm %s602_s0, 256  ;;  %p329_p5 = scmp.lt.u32.totalorder %s499_s25, %s602_s0 }
  0x17   : > { %p326_p4 = pnand %p325_p3, %p324_p2  ;;  %p330_p8 = scmp.lt.u32.totalorder %s328_s4, %s323_s30 }
  0x18   : > { %p332_p9 = scmp.lt.u32.totalorder %s323_s30, %s499_s25 }
  0x19   : > { %p327_p7 = pneg %p326_p4  ;;  %p331_p10 = por %p330_p8, %p329_p5 }
  0x1b   : > { %p333_p0 = por %p332_p9, %p331_p10 }
  0x1d   : > { %p334_p1 = pnand %p333_p0, %p327_p7 }
  0x1f   : > { %337 = shalt.err (!%p334_p1)
}
  0x20   : > { %s338_s13 = scalar_lea.vmem %s507_s27, 128  ;;  %s421_s14 = smov [#allocation2]  }
  0x21   : > { %p339_p2 = scmp.ne.s32.totalorder %s507_s27, %s338_s13  ;;  %s343_s16 = sshll.u32 %s421_s14, 4  ;;  %s344_s16 = int_to_ptr.vmem [resolvable:$false] %s343_s16 }
  0x22   : > { %s345_s20 = scalar_lea.vmem %s344_s16, 256  ;;  %p346_p11 = scmp.lt.s32.totalorder %s507_s27, %s344_s16 }
  0x23   : > { %p341_p4 = pnand %p339_p2, %p325_p3  ;;  %p347_p5 = scmp.lt.s32.totalorder %s345_s20, %s338_s13 }
  0x25   : > { %p342_p12 = pneg %p341_p4  ;;  %p348_p8 = por %p347_p5, %p346_p11 }
  0x27   : > { %p349_p9 = pnand %p348_p8, %p342_p12 }
  0x29   : > { %352 = shalt.err (!%p349_p9)
}
  0x2a   : > { %281 = dma.hbm_to_vmem [thread:$0]  (!%p503_p13), %s499_s25, 128, %s507_s27, %s88_s29  }
  0x2b   : > { %p610_p0 = scmp.lt.s32.totalorder %s419_s9, 3  ;;  %p611_p1 = scmp.ge.s32.totalorder %s419_s9, 1 }
  0x2d   : > { %p104_p3 = pnand %p611_p1, %p610_p0 }
  0x2e   : > { %s541_s21 = sand.u32 (!%p104_p3), 1, %s411_s7  }
  0x2f   : > { %107 = sbr.rel (%p104_p3) target bundleno = 197 (0xc5), region = 24  ;;  %s266_s22 = sshll.u32 (!%p104_p3), %s541_s21, 3 }
  0x30   : > { %s110_s23 = scalar_lea.sflag (!%p104_p3), [#allocation3], %s541_s21  ;;  %s113_s24 = scalar_lea.vmem (!%p104_p3), [#allocation2], %s266_s22 }
  0x36   : > { %398 = dma.done.wait (%p479_p6), %s110_s23, 128  }
  0x37   : > { %400 = vsyncadd (%p479_p6), %s110_s23, 4294967168  ;;  %v132_v0 = vld [vmem:[%s113_s24] sm:$0xff]  ;;  %vm136_vm0 = vcmask 1041408   ;;  %s267_s25 = sshll.u32 %s541_s21, 4  ;;  %vm162_vm1 = vcmask 1043456   ;;  %vm141_vm2 = vcmask 1046528  }
  0x38   : > { %v134_v1 = vrot.slane %v132_v0, 6  ;;  %vm148_vm3 = vcmask 1045504   ;;  %vm155_vm4 = vcmask 1044480   ;;  %vm167_vm5 = vcmask 261120   ;;  %s131_s17 = scalar_lea.vmem [#allocation5], %s267_s25  ;;  %s422_s26 = smov 32  }
  0x39   : > { %s423_s27 = smov 96   ;;  %s424_s28 = smov 64   ;;  %vm169_vm6 = vcmask 523264   ;;  %vm171_vm7 = vcmask 785408  }
  0x3a   : > { %v137_v2 = vsel %vm136_vm0, 0.0, %v134_v1  ;;  %v138_v3 = vsel %vm136_vm0, %v134_v1, 0.0  ;;  %s273_s29 = sshll.u32 %s457_s10, 8  ;;  %s190_s30 = sshll.u32 %s131_s17, 4  ;;  %s560_s30 = int_to_ptr.vmem [resolvable:$true] %s190_s30 }
  0x3b   : > { %v163_v4 = vrot.slane %v137_v2, 4  ;;  %v164_v5 = vrot.slane %v138_v3, 4  ;;  %v142_v6 = vrot.slane %v137_v2, 1  ;;  %v143_v7 = vrot.slane %v138_v3, 1  ;;  %s558_s4 = scalar_lea.hbm %s603_s1, %s273_s29  ;;  %s176_s10 = scalar_lea.sflag [#allocation4], %s541_s21 }
  0x3c   : > { %v149_v8 = vrot.slane %v137_v2, 2  ;;  %v150_v9 = vrot.slane %v138_v3, 2  ;;  %v156_v10 = vrot.slane %v137_v2, 3  ;;  %v157_v11 = vrot.slane %v138_v3, 3  ;;  %s353_s5 = scalar_lea.vmem %s560_s30, 256  ;;  %p612_p11 = scmp.ne.s32.totalorder %s607_s18, 0 }
  0x3d   : > { %v165_v12 = vsel %vm162_vm1, %v163_v4, %v164_v5  ;;  %v144_v13 = vsel %vm141_vm2, %v142_v6, %v143_v7  ;;  %p354_p6 = scmp.ne.s32.totalorder %s560_s30, %s353_s5  ;;  %s425_s11 = smov [#allocation5]  }
  0x3e   : > { %174 = vst.msk [vmem:[%s131_s17 + $0x8] sm:$0xff] %vm167_vm5, %v165_v12  ;;  %145 = vrot.lane.b32.xlu0 %v144_v13, %s422_s26  ;;  %v158_v14 = vsel %vm155_vm4, %v156_v10, %v157_v11  ;;  %v151_v15 = vsel %vm148_vm3, %v149_v8, %v150_v9  ;;  %s357_s13 = sshll.u32 %s425_s11, 4  ;;  %s358_s13 = int_to_ptr.vmem [resolvable:$false] %s357_s13 }
  0x3f   : > { %159 = vrot.lane.b32.xlu1 %v158_v14, %s423_s27  ;;  %p355_p12 = pnand %p354_p6, %p612_p11  ;;  %s359_s14 = scalar_lea.vmem %s358_s13, 512 }
  0x40   : > { %p360_p7 = scmp.lt.s32.totalorder %s560_s30, %s358_s13  ;;  %p361_p10 = scmp.lt.s32.totalorder %s359_s14, %s353_s5 }
  0x41   : > { %p356_p13 = pneg %p355_p12 }
  0x42   : > { %152 = vrot.lane.b32.xlu0 %v151_v15, %s424_s28  ;;  %p362_p2 = por %p361_p10, %p360_p7 }
  0x44   : > { %p363_p4 = pnand %p362_p2, %p356_p13 }
  0xb0   : > { %v146_v16 = vpop.permute.xlu0 %145 }
  0xb1   : > { %v160_v17 = vpop.permute.xlu1 %159  ;;  %v168_v18 = vsel %vm167_vm5, %v137_v2, %v146_v16 }
  0xb4   : > { %v153_v19 = vpop.permute.xlu0 %152 }
  0xb5   : > { %v170_v20 = vsel %vm169_vm6, %v168_v18, %v153_v19 }
  0xb6   : > { %v172_v21 = vsel %vm171_vm7, %v170_v20, %v160_v17 }
  0xb7   : > { %173 = vst [vmem:[%s131_s17] sm:$0xff] %v172_v21 }
  0xb8   : > { %366 = shalt.err (!%p363_p4)
}
  0xb9   : > { %s367_s16 = scalar_lea.hbm %s558_s4, 256  ;;  %s371_s22 = scalar_lea.hbm %s603_s1, 512 }
  0xba   : > { %p368_p5 = scmp.ne.s32.totalorder %s558_s4, %s367_s16  ;;  %p372_p0 = scmp.lt.u32.totalorder %s558_s4, %s603_s1 }
  0xbb   : > { %p373_p1 = scmp.lt.u32.totalorder %s371_s22, %s367_s16  ;;  %p375_p6 = scmp.lt.u32.totalorder %s367_s16, %s558_s4 }
  0xbc   : > { %p369_p8 = pnand %p368_p5, %p612_p11 }
  0xbd   : > { %p374_p3 = por %p373_p1, %p372_p0 }
  0xbe   : > { %p370_p9 = pneg %p369_p8 }
  0xbf   : > { %p376_p12 = por %p375_p6, %p374_p3 }
  0xc1   : > { %p377_p13 = pnand %p376_p12, %p370_p9 }
  0xc3   : > { %380 = shalt.err (!%p377_p13)
}
  0xc4   : > { %276 = dma.vmem_to_hbm [thread:$0]  (%p612_p11), %s560_s30, 256, %s558_s4, %s176_s10  }
  0xc5 PF: > { %s202_s25 = sand.u32 1, %s407_s6   ;;  %p613_p7 = scmp.ne.s32.totalorder %s608_s19, 0 }
  0xc6   : > { %p614_p10 = scmp.ge.s32.totalorder %s419_s9, 2  ;;  %s203_s17 = scalar_lea.sflag [#allocation4], %s202_s25 }
  0xc8   : > { %p283_p2 = pnand %p614_p10, %p613_p7 }
  0xca   : > { %402 = dma.done.wait (!%p283_p2), %s203_s17, 256  }
  0xcb   : > { %404 = vsyncadd (!%p283_p2), %s203_s17, 4294967040  ;;  %p14_p4 = scmp.ge.s32.totalorder %s461_s12, 4   ;;  %s615_s6 = smov %s411_s7 }
  0xcc   : > { %s616_s7 = smov %s415_s8  ;;  %s617_s8 = smov %s473_s15 }
  0xcd   : > { %s618_s9 = smov %s461_s12  ;;  %16 = sbr.rel (!%p14_p4) target bundleno = 5 (0x5), region = 69 }
  0xd4   :  { %208 = vsyncpa [#allocation3], 1 }
  0xd5   :  { %210 = vsyncpa [#allocation3 + $0x1], 1 }
  0xd6   :  { %211 = vsyncpa [#allocation4], 1 }
  0xd7   :  { %213 = vsyncpa [#allocation4 + $0x1], 1 }

</bundles_post_ra>
